<compile_context>
chip_gen: v5e
topology: v5e:2x2
jax: 0.10.0
libtpu: 0.0.40
codegen_flags: <defaults>
</compile_context>

<pallas_src>
import numpy as np
import jax
import jax.numpy as jnp
from jax.experimental import pallas as pl
from jax.experimental.pallas import tpu as pltpu

EPS = 1e-5
# Matmul-operand dtype for the large-contraction stages (2 and 3).  f32 accumulation is
# always used.  Set to jnp.float32 to recover ~1e-5 agreement with the reference.
MM_DTYPE = jnp.bfloat16


# ------------------------------------------------------------------- kernel --

def _make_stgcn_kernel(NB, T, V, K, COUT, KT):
    TV = T * V
    NTV = NB * TV
    PAD = (KT - 1) // 2

    def kernel(x_ref, w1_ref, b1_ref, ablk_ref, sh1_ref, w2_ref, shift_ref, o_ref):
        # x_ref:    (NB, CIN, TV)           f32, channel-major, lane-dense minor
        # w1_ref:   ((K+1)*COUT, CIN)       f32  [BN1-scaled GCN rows | BNres-scaled residual rows]
        # b1_ref:   (K*COUT, 1)             f32  GCN bias (BN1 scale folded)
        # ablk_ref: (K, NB*TV, NB*TV)       MM_DTYPE  kron(I_{NB*T}, A[k])
        # sh1_ref:  (COUT, 1)               f32  BN1 shift
        # w2_ref:   (COUT, KT*COUT)         MM_DTYPE  temporal taps, BN2 scale folded
        # shift_ref:(COUT, 1)               f32  all remaining biases / BN shifts
        # o_ref:    (NB, COUT, TV)          f32
        f32 = jnp.float32
        mm = ablk_ref.dtype

        # ---- samples stacked along lanes: (CIN, NB*T*V); cheap 128-aligned lane concat ----
        xw = jnp.concatenate([x_ref[n] for n in range(NB)], axis=1)

        # ---- stage 1: GCN 1x1 conv + residual 1x1 in ONE matmul (contraction = CIN) ------
        #      kept f32: contraction is only CIN=4, and it keeps the residual path exact.
        y1 = jnp.dot(w1_ref[...], xw, preferred_element_type=f32)     # ((K+1)*C, NTV)
        res = y1[K * COUT:, :]                                         # residual linear part

        # ---- stage 2: graph aggregation, contraction = NB*T*V = 256 (full MXU depth) -----
        g = None
        for k in range(K):
            lhs = (y1[k * COUT:(k + 1) * COUT, :]
                   + b1_ref[k * COUT:(k + 1) * COUT, :]).astype(mm)
            d = jnp.dot(lhs, ablk_ref[k], preferred_element_type=f32)
            g = d if g is None else g + d
        h = jnp.maximum(g + sh1_ref[...], 0.0)                         # BN1 shift + ReLU

        # ---- stage 3: temporal taps via XLU lane rolls + per-sample boundary masks -------
        #      tap_dt[c, (n,t,v)] = h[c, (n, t+dt-PAD, v)], zero outside [0,T); the mask on
        #      the *local* time index also kills any cross-sample wrap from the global roll.
        tloc = jax.lax.broadcasted_iota(jnp.int32, (COUT, NTV), 1) % TV
        taps = []
        for dt in range(KT):
            d = dt - PAD
            if d == 0:
                taps.append(h.astype(w2_ref.dtype))
            else:
                rolled = pltpu.roll(h, shift=(-d * V) % NTV, axis=1)
                valid = (tloc < TV - d * V) if d > 0 else (tloc >= -d * V)
                taps.append(jnp.where(valid, rolled, 0.0).astype(w2_ref.dtype))
        im2col = jnp.concatenate(taps, axis=0)                         # (KT*C, NTV), aligned

        # ---- temporal conv (BN2 folded) + residual + final shift + ReLU ------------------
        y = jnp.dot(w2_ref[...], im2col, preferred_element_type=f32)   # (C, NTV) f32
        out = jnp.maximum(y + res + shift_ref[...], 0.0)

        for n in range(NB):                                            # lane-dense stores
            o_ref[n] = out[:, n * TV:(n + 1) * TV]

    return kernel


def _pick_nb(N, COUT):
    """Largest divisor of N with NB*TV <= ~256 lanes worth of batching per step."""
    cap = max(1, 256 // COUT)
    nb = 1
    for d in range(1, min(N, cap) + 1):
        if N % d == 0:
            nb = d
    return nb


# ------------------------------------------------------------------ wrapper --

def stgcn_forward(x, A, p):
    """x: (N, Cin, T, V) float32, A: (K, V, V) float32.  Returns ((N, Cout, T, V), A)."""
    N, CIN, T, V = x.shape
    K = A.shape[0]
    COUT = p["bn1_gamma"].shape[0]
    KT = p["w_tcn"].shape[2]
    TV = T * V
    f32 = jnp.float32

    NB = _pick_nb(N, COUT)
    NTV = NB * TV

    # ---- fold BatchNorm (inference) scales into the conv weights (wrapper-side) ----------
    s1 = p["bn1_gamma"] / jnp.sqrt(p["bn1_var"] + EPS)
    s2 = p["bn2_gamma"] / jnp.sqrt(p["bn2_var"] + EPS)
    sr = p["bnr_gamma"] / jnp.sqrt(p["bnr_var"] + EPS)

    s1k = jnp.tile(s1, K)                                        # row (k*C+c) -> s1[c]
    w1aug = jnp.concatenate([p["w_gcn"] * s1k[:, None],          # GCN rows, BN1 scale folded
                             p["w_res"] * sr[:, None]], axis=0)  # residual rows, BNres scale
    b1c = (p["b_gcn"] * s1k).reshape(K * COUT, 1)
    sh1c = (p["bn1_beta"] - s1 * p["bn1_mean"]).reshape(COUT, 1)

    w2s = (jnp.transpose(p["w_tcn"], (0, 2, 1)).reshape(COUT, KT * COUT)
           * s2[:, None]).astype(MM_DTYPE)                       # (C, KT*C), tap-major cols
    shiftc = (s2 * p["b_tcn"] + p["bn2_beta"] - s2 * p["bn2_mean"]
              + sr * p["b_res"] + p["bnr_beta"] - sr * p["bnr_mean"]).reshape(COUT, 1)

    # graph operator for NB lane-stacked samples: kron(I_{NB*T}, A[k]) -> (NB*TV, NB*TV)
    eye_nt = jnp.eye(NB * T, dtype=f32)
    ablkd = jnp.einsum("tu,kvw->ktvuw", eye_nt, A).reshape(K, NTV, NTV).astype(MM_DTYPE)

    xm = x.reshape(N, CIN, TV)                                   # free reshape, no transpose

    # explicit, tight VMEM budget (double-buffered IO + constants + slack), << 32 MiB
    const_bytes = (w1aug.size * 4 + b1c.size * 4 + sh1c.size * 4 + shiftc.size * 4
                   + ablkd.size * ablkd.dtype.itemsize + w2s.size * w2s.dtype.itemsize)
    io_bytes = NB * (CIN + COUT) * TV * 4
    vmem_limit = int(min(32 * 2**20, 2 * (const_bytes + io_bytes) + 4 * 2**20))

    kernel = _make_stgcn_kernel(NB, T, V, K, COUT, KT)

    out = pl.pallas_call(
        kernel,
        out_shape=jax.ShapeDtypeStruct((N, COUT, TV), f32),
        grid=(N // NB,),
        in_specs=[
            pl.BlockSpec((NB, CIN, TV), lambda n: (n, 0, 0)),
            pl.BlockSpec(((K + 1) * COUT, CIN), lambda n: (0, 0)),
            pl.BlockSpec((K * COUT, 1), lambda n: (0, 0)),
            pl.BlockSpec((K, NTV, NTV), lambda n: (0, 0, 0)),
            pl.BlockSpec((COUT, 1), lambda n: (0, 0)),
            pl.BlockSpec((COUT, KT * COUT), lambda n: (0, 0)),
            pl.BlockSpec((COUT, 1), lambda n: (0, 0)),
        ],
        out_specs=pl.BlockSpec((NB, COUT, TV), lambda n: (n, 0, 0)),
        compiler_params=pltpu.CompilerParams(
            dimension_semantics=("parallel",),
            vmem_limit_bytes=vmem_limit),
    )(xm, w1aug, b1c, ablkd, sh1c, w2s, shiftc)

    return out.reshape(N, COUT, T, V), A


# ---------------------------------------------------------------- reference --

def stgcn_reference(x, A, p):
    N, CIN, T, V = x.shape
    K = A.shape[0]
    COUT = p["bn1_gamma"].shape[0]
    KT = p["w_tcn"].shape[2]
    PAD = (KT - 1) // 2

    def bn(u, gm, bt, mn, vr):
        s = gm / jnp.sqrt(vr + EPS)
        return u * s[None, :, None, None] + (bt - s * mn)[None, :, None, None]

    xc = jnp.einsum("nitv,oi->notv", x, p["w_gcn"]) + p["b_gcn"][None, :, None, None]
    x5 = xc.reshape(N, K, COUT, T, V)
    g = jnp.einsum("nkctv,kvw->nctw", x5, A)
    h = jax.nn.relu(bn(g, p["bn1_gamma"], p["bn1_beta"], p["bn1_mean"], p["bn1_var"]))
    hp = jnp.pad(h, ((0, 0), (0, 0), (PAD, PAD), (0, 0)))
    y = sum(jnp.einsum("nitv,oi->notv", hp[:, :, dt:dt + T, :], p["w_tcn"][:, :, dt])
            for dt in range(KT)) + p["b_tcn"][None, :, None, None]
    y = bn(y, p["bn2_gamma"], p["bn2_beta"], p["bn2_mean"], p["bn2_var"])
    r = jnp.einsum("nitv,oi->notv", x, p["w_res"]) + p["b_res"][None, :, None, None]
    r = bn(r, p["bnr_gamma"], p["bnr_beta"], p["bnr_mean"], p["bnr_var"])
    return jax.nn.relu(y + r), A


# ------------------------------------------------------------------- params --

def init_params(key, cin, cout, k_graph, kt):
    keys = jax.random.split(key, 16)

    def nrm(k, shape, scale):
        return (scale * jax.random.normal(k, shape)).astype(jnp.float32)

    return dict(
        w_gcn=nrm(keys[0], (k_graph * cout, cin), 1.0 / np.sqrt(cin)),
        b_gcn=nrm(keys[1], (k_graph * cout,), 0.1),
        w_tcn=nrm(keys[2], (cout, cout, kt), 1.0 / np.sqrt(cout * kt)),
        b_tcn=nrm(keys[3], (cout,), 0.1),
        w_res=nrm(keys[4], (cout, cin), 1.0 / np.sqrt(cin)),
        b_res=nrm(keys[5], (cout,), 0.1),
        bn1_gamma=(1.0 + 0.1 * jax.random.normal(keys[6], (cout,))).astype(jnp.float32),
        bn1_beta=nrm(keys[7], (cout,), 0.1),
        bn1_mean=nrm(keys[8], (cout,), 0.1),
        bn1_var=jax.random.uniform(keys[9], (cout,), minval=0.5, maxval=1.5).astype(jnp.float32),
        bn2_gamma=(1.0 + 0.1 * jax.random.normal(keys[10], (cout,))).astype(jnp.float32),
        bn2_beta=nrm(keys[11], (cout,), 0.1),
        bn2_mean=nrm(keys[12], (cout,), 0.1),
        bn2_var=jax.random.uniform(keys[13], (cout,), minval=0.5, maxval=1.5).astype(jnp.float32),
        bnr_gamma=jnp.ones((cout,), jnp.float32),
        bnr_beta=jnp.zeros((cout,), jnp.float32),
        bnr_mean=nrm(keys[14], (cout,), 0.1),
        bnr_var=jax.random.uniform(keys[15], (cout,), minval=0.5, maxval=1.5).astype(jnp.float32),
    )


if __name__ == "__main__":
    # STGCN(in_channels=4, out_channels=32, kernel_size=(3, 2), stride=1)
    N, CIN, COUT, T, V = 2, 4, 32, 8, 16
    KT, K = 3, 2

    key = jax.random.PRNGKey(0)
    kx, ka, kp = jax.random.split(key, 3)
    x = jax.random.normal(kx, (N, CIN, T, V), jnp.float32)
    A = (0.3 * jax.random.normal(ka, (K, V, V))).astype(jnp.float32)
    params = init_params(kp, CIN, COUT, K, KT)

    out, A_out = jax.jit(stgcn_forward)(x, A, params)
    out = jax.block_until_ready(out)

    ref, _ = stgcn_reference(x, A, params)
    # Stages 2-3 use bf16 matmul operands with f32 accumulation (per perf review); the atol
    # covers bf16 operand rounding.  Set MM_DTYPE = jnp.float32 to recover ~1e-5 agreement.
    if MM_DTYPE == jnp.bfloat16:
        rtol, atol = 1e-2, 2e-2
    else:
        rtol, atol = 1e-5, 1e-5
    np.testing.assert_allclose(np.asarray(out), np.asarray(ref), rtol=rtol, atol=atol)
    assert out.shape == (N, COUT, T, V)
    print("KERNEL_OK")
</pallas_src>

<mosaic_0001>
module attributes {stable_mosaic.version = 11 : i64} {
  func.func @kernel(%arg0: i32, %arg1: memref<2x4x128xf32, #tpu.memory_space<vmem>>, %arg2: memref<96x4xf32, #tpu.memory_space<vmem>>, %arg3: memref<64x1xf32, #tpu.memory_space<vmem>>, %arg4: memref<2x256x256xbf16, #tpu.memory_space<vmem>>, %arg5: memref<32x1xf32, #tpu.memory_space<vmem>>, %arg6: memref<32x96xbf16, #tpu.memory_space<vmem>>, %arg7: memref<32x1xf32, #tpu.memory_space<vmem>>, %arg8: memref<2x32x128xf32, #tpu.memory_space<vmem>>) attributes {dimension_semantics = [#tpu.dimension_semantics<parallel>], iteration_bounds = array<i64: 1>, scalar_prefetch = 0 : i64, scratch_operands = 0 : i64, tpu.core_type = #tpu.core_type<tc>, window_params = [{transform_indices = @transform_0, window_bounds = array<i64: 2, 4, 128>}, {pipeline_mode = #tpu.pipeline_mode<synchronous>, transform_indices = @transform_1, window_bounds = array<i64: 96, 4>}, {pipeline_mode = #tpu.pipeline_mode<synchronous>, transform_indices = @transform_2, window_bounds = array<i64: 64, 1>}, {pipeline_mode = #tpu.pipeline_mode<synchronous>, transform_indices = @transform_3, window_bounds = array<i64: 2, 256, 256>}, {pipeline_mode = #tpu.pipeline_mode<synchronous>, transform_indices = @transform_4, window_bounds = array<i64: 32, 1>}, {pipeline_mode = #tpu.pipeline_mode<synchronous>, transform_indices = @transform_5, window_bounds = array<i64: 32, 96>}, {pipeline_mode = #tpu.pipeline_mode<synchronous>, transform_indices = @transform_6, window_bounds = array<i64: 32, 1>}, {transform_indices = @transform_7, window_bounds = array<i64: 2, 32, 128>}]} {
    %c0 = arith.constant 0 : index
    %c0_0 = arith.constant 0 : index
    %c0_1 = arith.constant 0 : index
    %0 = vector.load %arg1[%c0, %c0_0, %c0_1] : memref<2x4x128xf32, #tpu.memory_space<vmem>>, vector<1x4x128xf32>
    %1 = vector.shape_cast %0 : vector<1x4x128xf32> to vector<4x128xf32>
    %c1 = arith.constant 1 : index
    %c0_2 = arith.constant 0 : index
    %c0_3 = arith.constant 0 : index
    %2 = vector.load %arg1[%c1, %c0_2, %c0_3] : memref<2x4x128xf32, #tpu.memory_space<vmem>>, vector<1x4x128xf32>
    %3 = vector.shape_cast %2 : vector<1x4x128xf32> to vector<4x128xf32>
    %4 = tpu.concatenate %1, %3 in 1 : vector<4x128xf32>, vector<4x128xf32> -> vector<4x256xf32>
    %c0_4 = arith.constant 0 : index
    %c0_5 = arith.constant 0 : index
    %5 = vector.load %arg2[%c0_4, %c0_5] : memref<96x4xf32, #tpu.memory_space<vmem>>, vector<96x4xf32>
    %cst = arith.constant dense<0.000000e+00> : vector<96x256xf32>
    %6 = tpu.matmul %5, %4, %cst {dimension_numbers = #tpu.dot_dimension_numbers<[1], [0], [0], [1], [0, 0, 1, 1], [], []>} : vector<96x4xf32>, vector<4x256xf32>, vector<96x256xf32> -> vector<96x256xf32>
    %7 = vector.extract_strided_slice %6 {offsets = [64, 0], sizes = [32, 256], strides = [1, 1]} : vector<96x256xf32> to vector<32x256xf32>
    %8 = vector.extract_strided_slice %6 {offsets = [0, 0], sizes = [32, 256], strides = [1, 1]} : vector<96x256xf32> to vector<32x256xf32>
    %c0_6 = arith.constant 0 : index
    %c0_7 = arith.constant 0 : index
    %9 = vector.load %arg3[%c0_6, %c0_7] : memref<64x1xf32, #tpu.memory_space<vmem>>, vector<32x1xf32>
    %10 = vector.broadcast %9 : vector<32x1xf32> to vector<32x256xf32>
    %11 = arith.addf %8, %10 : vector<32x256xf32>
    %12 = arith.truncf %11 : vector<32x256xf32> to vector<32x256xbf16>
    %c0_8 = arith.constant 0 : index
    %c0_9 = arith.constant 0 : index
    %c0_10 = arith.constant 0 : index
    %13 = vector.load %arg4[%c0_8, %c0_9, %c0_10] : memref<2x256x256xbf16, #tpu.memory_space<vmem>>, vector<1x256x256xbf16>
    %14 = vector.shape_cast %13 : vector<1x256x256xbf16> to vector<256x256xbf16>
    %cst_11 = arith.constant dense<0.000000e+00> : vector<32x256xf32>
    %15 = tpu.matmul %12, %14, %cst_11 {dimension_numbers = #tpu.dot_dimension_numbers<[1], [0], [0], [1], [0, 0, 1, 1], [], []>} : vector<32x256xbf16>, vector<256x256xbf16>, vector<32x256xf32> -> vector<32x256xf32>
    %16 = vector.extract_strided_slice %6 {offsets = [32, 0], sizes = [32, 256], strides = [1, 1]} : vector<96x256xf32> to vector<32x256xf32>
    %c32 = arith.constant 32 : index
    %c0_12 = arith.constant 0 : index
    %17 = vector.load %arg3[%c32, %c0_12] : memref<64x1xf32, #tpu.memory_space<vmem>>, vector<32x1xf32>
    %18 = vector.broadcast %17 : vector<32x1xf32> to vector<32x256xf32>
    %19 = arith.addf %16, %18 : vector<32x256xf32>
    %20 = arith.truncf %19 : vector<32x256xf32> to vector<32x256xbf16>
    %c1_13 = arith.constant 1 : index
    %c0_14 = arith.constant 0 : index
    %c0_15 = arith.constant 0 : index
    %21 = vector.load %arg4[%c1_13, %c0_14, %c0_15] : memref<2x256x256xbf16, #tpu.memory_space<vmem>>, vector<1x256x256xbf16>
    %22 = vector.shape_cast %21 : vector<1x256x256xbf16> to vector<256x256xbf16>
    %cst_16 = arith.constant dense<0.000000e+00> : vector<32x256xf32>
    %23 = tpu.matmul %20, %22, %cst_16 {dimension_numbers = #tpu.dot_dimension_numbers<[1], [0], [0], [1], [0, 0, 1, 1], [], []>} : vector<32x256xbf16>, vector<256x256xbf16>, vector<32x256xf32> -> vector<32x256xf32>
    %24 = arith.addf %15, %23 : vector<32x256xf32>
    %c0_17 = arith.constant 0 : index
    %c0_18 = arith.constant 0 : index
    %25 = vector.load %arg5[%c0_17, %c0_18] : memref<32x1xf32, #tpu.memory_space<vmem>>, vector<32x1xf32>
    %26 = vector.broadcast %25 : vector<32x1xf32> to vector<32x256xf32>
    %27 = arith.addf %24, %26 : vector<32x256xf32>
    %cst_19 = arith.constant 0.000000e+00 : f32
    %28 = vector.broadcast %cst_19 : f32 to vector<32x256xf32>
    %29 = arith.maximumf %27, %28 : vector<32x256xf32>
    %30 = tpu.iota {dimensions = array<i32: 1>} : vector<32x256xi32>
    %c128_i32 = arith.constant 128 : i32
    %c0_i32 = arith.constant 0 : i32
    %31 = arith.cmpi eq, %c128_i32, %c0_i32 : i32
    %c1_i32 = arith.constant 1 : i32
    %32 = arith.select %31, %c1_i32, %c128_i32 : i32
    %33 = vector.broadcast %32 : i32 to vector<32x256xi32>
    %34 = arith.remsi %30, %33 : vector<32x256xi32>
    %c0_i32_20 = arith.constant 0 : i32
    %35 = vector.broadcast %c0_i32_20 : i32 to vector<32x256xi32>
    %36 = arith.cmpi ne, %34, %35 : vector<32x256xi32>
    %c0_i32_21 = arith.constant 0 : i32
    %37 = vector.broadcast %c0_i32_21 : i32 to vector<32x256xi32>
    %38 = arith.cmpi slt, %34, %37 : vector<32x256xi32>
    %c0_i32_22 = arith.constant 0 : i32
    %39 = arith.cmpi slt, %32, %c0_i32_22 : i32
    %40 = vector.broadcast %39 : i1 to vector<32x256xi1>
    %41 = vector.broadcast %40 : vector<32x256xi1> to vector<32x256xi1>
    %42 = arith.xori %38, %41 : vector<32x256xi1>
    %43 = arith.andi %42, %36 : vector<32x256xi1>
    %44 = vector.broadcast %32 : i32 to vector<32x256xi32>
    %45 = arith.addi %34, %44 : vector<32x256xi32>
    %46 = arith.select %43, %45, %34 : vector<32x256xi1>, vector<32x256xi32>
    %c16_i32 = arith.constant 16 : i32
    %47 = tpu.dynamic_rotate %29 by %c16_i32 dim 1 : vector<32x256xf32>, i32 -> vector<32x256xf32>
    %c16_i32_23 = arith.constant 16 : i32
    %48 = vector.broadcast %c16_i32_23 : i32 to vector<32x256xi32>
    %49 = arith.cmpi sge, %46, %48 : vector<32x256xi32>
    %cst_24 = arith.constant 0.000000e+00 : f32
    %50 = vector.broadcast %cst_24 : f32 to vector<32x256xf32>
    %51 = arith.select %49, %47, %50 : vector<32x256xi1>, vector<32x256xf32>
    %52 = arith.truncf %51 : vector<32x256xf32> to vector<32x256xbf16>
    %53 = arith.truncf %29 : vector<32x256xf32> to vector<32x256xbf16>
    %c240_i32 = arith.constant 240 : i32
    %54 = tpu.dynamic_rotate %29 by %c240_i32 dim 1 : vector<32x256xf32>, i32 -> vector<32x256xf32>
    %c112_i32 = arith.constant 112 : i32
    %55 = vector.broadcast %c112_i32 : i32 to vector<32x256xi32>
    %56 = arith.cmpi slt, %46, %55 : vector<32x256xi32>
    %cst_25 = arith.constant 0.000000e+00 : f32
    %57 = vector.broadcast %cst_25 : f32 to vector<32x256xf32>
    %58 = arith.select %56, %54, %57 : vector<32x256xi1>, vector<32x256xf32>
    %59 = arith.truncf %58 : vector<32x256xf32> to vector<32x256xbf16>
    %60 = tpu.concatenate %52, %53, %59 in 0 : vector<32x256xbf16>, vector<32x256xbf16>, vector<32x256xbf16> -> vector<96x256xbf16>
    %c0_26 = arith.constant 0 : index
    %c0_27 = arith.constant 0 : index
    %61 = vector.load %arg6[%c0_26, %c0_27] : memref<32x96xbf16, #tpu.memory_space<vmem>>, vector<32x96xbf16>
    %cst_28 = arith.constant dense<0.000000e+00> : vector<32x256xf32>
    %62 = tpu.matmul %61, %60, %cst_28 {dimension_numbers = #tpu.dot_dimension_numbers<[1], [0], [0], [1], [0, 0, 1, 1], [], []>} : vector<32x96xbf16>, vector<96x256xbf16>, vector<32x256xf32> -> vector<32x256xf32>
    %63 = arith.addf %62, %7 : vector<32x256xf32>
    %c0_29 = arith.constant 0 : index
    %c0_30 = arith.constant 0 : index
    %64 = vector.load %arg7[%c0_29, %c0_30] : memref<32x1xf32, #tpu.memory_space<vmem>>, vector<32x1xf32>
    %65 = vector.broadcast %64 : vector<32x1xf32> to vector<32x256xf32>
    %66 = arith.addf %63, %65 : vector<32x256xf32>
    %cst_31 = arith.constant 0.000000e+00 : f32
    %67 = vector.broadcast %cst_31 : f32 to vector<32x256xf32>
    %68 = arith.maximumf %66, %67 : vector<32x256xf32>
    %69 = vector.extract_strided_slice %68 {offsets = [0, 0], sizes = [32, 128], strides = [1, 1]} : vector<32x256xf32> to vector<32x128xf32>
    %c0_32 = arith.constant 0 : index
    %c0_33 = arith.constant 0 : index
    %c0_34 = arith.constant 0 : index
    %70 = vector.load %arg8[%c0_32, %c0_33, %c0_34] : memref<2x32x128xf32, #tpu.memory_space<vmem>>, vector<1x32x128xf32>
    %71 = vector.shape_cast %70 : vector<1x32x128xf32> to vector<32x128xf32>
    %72 = vector.shape_cast %69 : vector<32x128xf32> to vector<1x32x128xf32>
    tpu.vector_store %arg8[%c0_32, %c0_33, %c0_34], %72 {strides = array<i32>} : memref<2x32x128xf32, #tpu.memory_space<vmem>>, vector<1x32x128xf32>,
    %73 = vector.extract_strided_slice %68 {offsets = [0, 128], sizes = [32, 128], strides = [1, 1]} : vector<32x256xf32> to vector<32x128xf32>
    %c1_35 = arith.constant 1 : index
    %c0_36 = arith.constant 0 : index
    %c0_37 = arith.constant 0 : index
    %74 = vector.load %arg8[%c1_35, %c0_36, %c0_37] : memref<2x32x128xf32, #tpu.memory_space<vmem>>, vector<1x32x128xf32>
    %75 = vector.shape_cast %74 : vector<1x32x128xf32> to vector<32x128xf32>
    %76 = vector.shape_cast %73 : vector<32x128xf32> to vector<1x32x128xf32>
    tpu.vector_store %arg8[%c1_35, %c0_36, %c0_37], %76 {strides = array<i32>} : memref<2x32x128xf32, #tpu.memory_space<vmem>>, vector<1x32x128xf32>,
    return
  }
  func.func @transform_0(%arg0: i32) -> (i32, i32, i32) {
    %c0_i32 = arith.constant 0 : i32
    %c0_i32_0 = arith.constant 0 : i32
    %c0_i32_1 = arith.constant 0 : i32
    return %arg0, %c0_i32, %c0_i32_0 : i32, i32, i32
  }
  func.func @transform_1(%arg0: i32) -> (i32, i32) {
    %c0_i32 = arith.constant 0 : i32
    %c0_i32_0 = arith.constant 0 : i32
    %c0_i32_1 = arith.constant 0 : i32
    return %c0_i32, %c0_i32_0 : i32, i32
  }
  func.func @transform_2(%arg0: i32) -> (i32, i32) {
    %c0_i32 = arith.constant 0 : i32
    %c0_i32_0 = arith.constant 0 : i32
    %c0_i32_1 = arith.constant 0 : i32
    return %c0_i32, %c0_i32_0 : i32, i32
  }
  func.func @transform_3(%arg0: i32) -> (i32, i32, i32) {
    %c0_i32 = arith.constant 0 : i32
    %c0_i32_0 = arith.constant 0 : i32
    %c0_i32_1 = arith.constant 0 : i32
    %c0_i32_2 = arith.constant 0 : i32
    return %c0_i32, %c0_i32_0, %c0_i32_1 : i32, i32, i32
  }
  func.func @transform_4(%arg0: i32) -> (i32, i32) {
    %c0_i32 = arith.constant 0 : i32
    %c0_i32_0 = arith.constant 0 : i32
    %c0_i32_1 = arith.constant 0 : i32
    return %c0_i32, %c0_i32_0 : i32, i32
  }
  func.func @transform_5(%arg0: i32) -> (i32, i32) {
    %c0_i32 = arith.constant 0 : i32
    %c0_i32_0 = arith.constant 0 : i32
    %c0_i32_1 = arith.constant 0 : i32
    return %c0_i32, %c0_i32_0 : i32, i32
  }
  func.func @transform_6(%arg0: i32) -> (i32, i32) {
    %c0_i32 = arith.constant 0 : i32
    %c0_i32_0 = arith.constant 0 : i32
    %c0_i32_1 = arith.constant 0 : i32
    return %c0_i32, %c0_i32_0 : i32, i32
  }
  func.func @transform_7(%arg0: i32) -> (i32, i32, i32) {
    %c0_i32 = arith.constant 0 : i32
    %c0_i32_0 = arith.constant 0 : i32
    %c0_i32_1 = arith.constant 0 : i32
    return %arg0, %c0_i32, %c0_i32_0 : i32, i32, i32
  }
}

</mosaic_0001>

<bundles_post_ra>
// kernel: tile.9
= control target key start
LH: loop header
LB: loop body
LE: loop exit
PB: predicated region body
PF: predicated region fallthrough
CT: control target
= control target key end

     0   :  { %s22_s0 = inlined_call_operand.vmem [shape: f32[32], index: 0, kind: input, shape index: {}]   ;;  %s23_s1 = inlined_call_operand.vmem [shape: f32[2,32], index: 1, kind: output, shape index: {}]  }
   0x1   :  { %v4_v0 = vld [vmem:[%s22_s0] ss:$0 sm:$0xff] }
   0x2   :  { %5 = vst [vmem:[%s23_s1] sm:$0x3] %v4_v0 }

// kernel: mul.19
= control target key start
LH: loop header
LB: loop body
LE: loop exit
PB: predicated region body
PF: predicated region fallthrough
CT: control target
= control target key end

     0   :  { %vm7_vm0 = vcmask 261120   ;;  %vm13_vm1 = vcmask 523520   ;;  %s39_s0 = inlined_call_operand.vmem [shape: f32[2,32], index: 0, kind: input, shape index: {}]   ;;  %s40_s1 = inlined_call_operand.vmem [shape: f32[64], index: 1, kind: output, shape index: {}]  }
   0x1   :  { %v4_v0 = vld [vmem:[%s39_s0] sm:$0x3]  ;;  %s22_s0 = smov 32  }
   0x2   :  { %5 = vst [vmem:[#allocation1] sm:$0x3] %v4_v0 }
   0x9   :  { %v10_v1 = vld [vmem:[#allocation1 + $0x1] sm:$0x1]   ;;  %v6_v2 = vld [vmem:[#allocation1] sm:$0x1]  }
   0xa   :  { %11 = vrot.lane.b32.xlu0 %v10_v1, %s22_s0  ;;  %8 = vst.msk [vmem:[#allocation0] sm:$0x1] %vm7_vm0, %v6_v2  }
  0x7c   :  { %v12_v3 = vpop.permute.xlu0 %11  }
  0x7d   :  { %14 = vst.msk [vmem:[#allocation0] sm:$0x1] %vm13_vm1, %v12_v3  }
  0x84   :  { %v17_v4 = vld [vmem:[#allocation0] sm:$0x1] }
  0x85   :  { %20 = vst [vmem:[%s40_s1] sm:$0x1] %v17_v4 }

// kernel: stgcn_forward.1
= control target key start
LH: loop header
LB: loop body
LE: loop exit
PB: predicated region body
PF: predicated region fallthrough
CT: control target
= control target key end

     0   :  { %vm79_vm0 = vcmask 1043456   ;;  %vm42_vm1 = vcmask 31744   ;;  %v1577_v3 = vmov 0   ;;  %s1579_s17 = smov 16   ;;  %vm1024_vm7 = vcmask 785408   ;;  %s2319_s0 = inlined_call_operand.vmem [shape: f32[2,4,128], index: 0, kind: input, shape index: {}]   ;;  %s2320_s1 = inlined_call_operand.vmem [shape: f32[96,4], index: 1, kind: input, shape index: {}]   ;;  %s2321_s2 = inlined_call_operand.vmem [shape: f32[64,1], index: 2, kind: input, shape index: {}]   ;;  %s2322_s4 = inlined_call_operand.vmem [shape: f32[32,1], index: 4, kind: input, shape index: {}]   ;;  %s2323_s3 = inlined_call_operand.vmem [shape: bf16[2,256,256], index: 3, kind: input, shape index: {}]   ;;  %s2324_s6 = inlined_call_operand.vmem [shape: f32[32,1], index: 6, kind: input, shape index: {}]   ;;  %s2325_s5 = inlined_call_operand.vmem [shape: bf16[32,96], index: 5, kind: input, shape index: {}]   ;;  %s2326_s7 = inlined_call_operand.vmem [shape: f32[2,32,128], index: 7, kind: output, shape index: {}]  }
   0x1   :  { %v27_v0 = vld [vmem:[%s2319_s0] sm:$0xf]  ;;  %v1122_v1 = vld [vmem:[%s2319_s0 + $0x4] sm:$0xf]  ;;  %1534 = vset.pattern.permute.xlu0 %v1577_v3  ;;  %1535 = vset.pattern.permute.xlu1 %v1577_v3  ;;  %v262_v5 = vld [vmem:[%s2321_s2 + $0x30] sm:$0xff] }
   0x2   :  { %v30_v2 = vld [vmem:[%s2320_s1] sm:$0xff]  ;;  %1123 = vmatpush.msk.msra.mxu0 %vm79_vm0, %v27_v0  ;;  %1136 = vmatpush.msk.msra.mxu1 %vm79_vm0, %v1122_v1  ;;  %v31_v7 = vld [vmem:[%s2320_s1 + $0x8] sm:$0xff]  ;;  %v263_v9 = vld [vmem:[%s2321_s2 + $0x38] sm:$0xff] }
   0x3   :  { %v260_v4 = vld [vmem:[%s2321_s2 + $0x20] sm:$0xff]  ;;  %1124 = vmatmul.msk.f32.vlgmr.msra.gmra.mxu0 %vm42_vm1, %v30_v2  ;;  %1137 = vmatmul.msk.f32.vlgmr.msra.gmra.mxu1 %vm42_vm1, %v30_v2  ;;  %v261_v8 = vld [vmem:[%s2321_s2 + $0x28] sm:$0xff]  ;;  %v32_v11 = vld [vmem:[%s2320_s1 + $0x10] sm:$0xff] }
   0x4   :  { %266 = vperm.xlu0 %1534, %v260_v4   ;;  %276 = vperm.xlu1 %1535, %v262_v5   ;;  %v192_v6 = vld [vmem:[%s2321_s2] sm:$0xff]  ;;  %v193_v10 = vld [vmem:[%s2321_s2 + $0x8] sm:$0xff]  ;;  %v194_v12 = vld [vmem:[%s2321_s2 + $0x10] sm:$0xff] }
   0x5   :  { %1536 = vset.pattern.permute.xlu2 %v1577_v3  ;;  %v195_v13 = vld [vmem:[%s2321_s2 + $0x18] sm:$0xff]  ;;  %v801_v16 = vld [vmem:[%s2322_s4] sm:$0xff]  ;;  %v1467_v18 = vld [vmem:[%s2323_s3 + $0x74] sm:$0xf] }
   0x6   :  { %198 = vperm.xlu2 %1536, %v192_v6   ;;  %v33_v14 = vld [vmem:[%s2320_s1 + $0x18] sm:$0xff]  ;;  %v34_v17 = vld [vmem:[%s2320_s1 + $0x20] sm:$0xff]  ;;  %v1483_v20 = vld [vmem:[%s2323_s3 + $0xf4] sm:$0xf] }
   0x7   :  { %v804_v15 = vld [vmem:[%s2322_s4 + $0x18] sm:$0xff]  ;;  %v1465_v23 = vld [vmem:[%s2323_s3 + $0x64] sm:$0xf]  ;;  %v1361_v24 = vld [vmem:[%s2323_s3 + $0x68] sm:$0xf0] }
   0x8   :  { %v1369_v19 = vld [vmem:[%s2323_s3 + $0x78] sm:$0xf0]  ;;  %v1481_v26 = vld [vmem:[%s2323_s3 + $0xe4] sm:$0xf]  ;;  %v1425_v27 = vld [vmem:[%s2323_s3 + $0xe8] sm:$0xf0]  ;;  %v1364_v28 = vor.u32 %v1465_v23, %v1361_v24 }
   0x9   :  { %v1372_v21 = vor.u32 %v1467_v18, %v1369_v19  ;;  %v1433_v22 = vld [vmem:[%s2323_s3 + $0xf8] sm:$0xf0]  ;;  %v35_v29 = vld [vmem:[%s2320_s1 + $0x28] sm:$0xff]  ;;  %v1428_v30 = vor.u32 %v1481_v26, %v1425_v27  ;;  %v1463_v31 = vld [vmem:[%s2323_s3 + $0x54] sm:$0xf] }
   0xa   :  { %v1436_v25 = vor.u32 %v1483_v20, %v1433_v22  ;;  %v1353_v32 = vld [vmem:[%s2323_s3 + $0x58] sm:$0xf0]  ;;  %v1479_v33 = vld [vmem:[%s2323_s3 + $0xd4] sm:$0xf]  ;;  %v1461_v36 = vld [vmem:[%s2323_s3 + $0x44] sm:$0xf] }
   0xb   :  { %1125 = vmatmul.msk.f32.gmra.mxu0 %vm42_vm1, %v31_v7  ;;  %1138 = vmatmul.msk.f32.gmra.mxu1 %vm42_vm1, %v31_v7  ;;  %v1356_v34 = vor.u32 %v1463_v31, %v1353_v32  ;;  %v1417_v35 = vld [vmem:[%s2323_s3 + $0xd8] sm:$0xf0]  ;;  %v1345_v37 = vld [vmem:[%s2323_s3 + $0x48] sm:$0xf0]  ;;  %v1477_v39 = vld [vmem:[%s2323_s3 + $0xc4] sm:$0xf] }
   0xc   :  { %271 = vperm.xlu0 %1534, %v261_v8   ;;  %281 = vperm.xlu1 %1535, %v263_v9   ;;  %v1420_v38 = vor.u32 %v1479_v33, %v1417_v35  ;;  %v1409_v40 = vld [vmem:[%s2323_s3 + $0xc8] sm:$0xf0]  ;;  %v1348_v41 = vor.u32 %v1461_v36, %v1345_v37  ;;  %v36_v42 = vld [vmem:[%s2320_s1 + $0x30] sm:$0xff]  ;;  %v1337_v46 = vld [vmem:[%s2323_s3 + $0x38] sm:$0xf0] }
   0xd   :  { %763 = vmatpush.bf16.msrb.mxu0 %v1372_v21  ;;  %782 = vmatpush.bf16.msrb.mxu1 %v1436_v25  ;;  %v1412_v43 = vor.u32 %v1477_v39, %v1409_v40  ;;  %v803_v44 = vld [vmem:[%s2322_s4 + $0x10] sm:$0xff]  ;;  %v1401_v49 = vld [vmem:[%s2323_s3 + $0xb8] sm:$0xf0]  ;;  %v38_v52 = vld [vmem:[%s2320_s1 + $0x40] sm:$0xff] }
   0xe   :  { %203 = vperm.xlu2 %1536, %v193_v10   ;;  %v1459_v45 = vld [vmem:[%s2323_s3 + $0x34] sm:$0xf]  ;;  %v37_v51 = vld [vmem:[%s2320_s1 + $0x38] sm:$0xff]  ;;  %v39_v53 = vld [vmem:[%s2320_s1 + $0x48] sm:$0xff] }
   0xf   :  { %v1340_v47 = vor.u32 %v1459_v45, %v1337_v46  ;;  %v1475_v48 = vld [vmem:[%s2323_s3 + $0xb4] sm:$0xf]  ;;  %v1457_v55 = vld [vmem:[%s2323_s3 + $0x24] sm:$0xf]  ;;  %v1329_v56 = vld [vmem:[%s2323_s3 + $0x28] sm:$0xf0] }
  0x10   :  { %v1404_v50 = vor.u32 %v1475_v48, %v1401_v49  ;;  %v40_v54 = vld [vmem:[%s2320_s1 + $0x50] sm:$0xff]  ;;  %v1473_v57 = vld [vmem:[%s2323_s3 + $0xa4] sm:$0xf]  ;;  %v1332_v58 = vor.u32 %v1457_v55, %v1329_v56  ;;  %v1393_v59 = vld [vmem:[%s2323_s3 + $0xa8] sm:$0xf0] }
  0x11   :  { %764 = vmatpush.bf16.msrb.mxu0 %v1364_v28  ;;  %783 = vmatpush.bf16.msrb.mxu1 %v1428_v30  ;;  %v1396_v60 = vor.u32 %v1473_v57, %v1393_v59  ;;  %v41_v61 = vld [vmem:[%s2320_s1 + $0x58] sm:$0xff]  ;;  %v802_v62 = vld [vmem:[%s2322_s4 + $0x8] sm:$0xff]  ;;  %v1455_v63 = vld [vmem:[%s2323_s3 + $0x14] sm:$0xf] }
  0x12   :  { %v1321_v0 = vld [vmem:[%s2323_s3 + $0x18] sm:$0xf0]  ;;  %v1471_v1 = vld [vmem:[%s2323_s3 + $0x94] sm:$0xf]  ;;  %v1453_v5 = vld [vmem:[%s2323_s3 + $0x4] sm:$0xf] }
  0x13   :  { %1126 = vmatmul.msk.f32.gmra.mxu0 %vm42_vm1, %v32_v11  ;;  %1139 = vmatmul.msk.f32.gmra.mxu1 %vm42_vm1, %v32_v11  ;;  %v1385_v2 = vld [vmem:[%s2323_s3 + $0x98] sm:$0xf0]  ;;  %v1324_v3 = vor.u32 %v1455_v63, %v1321_v0  ;;  %v1313_v6 = vld [vmem:[%s2323_s3 + $0x8] sm:$0xf0]  ;;  %v1469_v7 = vld [vmem:[%s2323_s3 + $0x84] sm:$0xf] }
  0x14   :  { %208 = vperm.xlu0 %1534, %v194_v12   ;;  %213 = vperm.xlu1 %1535, %v195_v13   ;;  %v1388_v4 = vor.u32 %v1471_v1, %v1385_v2  ;;  %v1316_v8 = vor.u32 %v1453_v5, %v1313_v6  ;;  %v1377_v9 = vld [vmem:[%s2323_s3 + $0x88] sm:$0xf0]  ;;  %v1239_v11 = vld [vmem:[%s2323_s3 + $0x170] sm:$0xf]  ;;  %v1500_v12 = vld [vmem:[%s2323_s3 + $0x174] sm:$0xf0] }
  0x15   :  { %765 = vmatpush.bf16.msrb.mxu0 %v1356_v34  ;;  %784 = vmatpush.bf16.msrb.mxu1 %v1420_v38  ;;  %v1380_v10 = vor.u32 %v1469_v7, %v1377_v9  ;;  %v1303_v13 = vld [vmem:[%s2323_s3 + $0x1f0] sm:$0xf]  ;;  %v1498_v18 = vld [vmem:[%s2323_s3 + $0x164] sm:$0xf0]  ;;  %v1295_v19 = vld [vmem:[%s2323_s3 + $0x1e0] sm:$0xf] }
  0x16   :  { %817 = vperm.xlu2 %1536, %v803_v44   ;;  %v1514_v21 = vld [vmem:[%s2323_s3 + $0x1e4] sm:$0xf0]  ;;  %v1223_v23 = vld [vmem:[%s2323_s3 + $0x150] sm:$0xf]  ;;  %v1496_v24 = vld [vmem:[%s2323_s3 + $0x154] sm:$0xf0] }
  0x17   :  { %v1296_v22 = vor.u32 %v1514_v21, %v1295_v19  ;;  %v1287_v25 = vld [vmem:[%s2323_s3 + $0x1d0] sm:$0xf]  ;;  %v1224_v26 = vor.u32 %v1496_v24, %v1223_v23  ;;  %v1512_v27 = vld [vmem:[%s2323_s3 + $0x1d4] sm:$0xf0]  ;;  %v1494_v30 = vld [vmem:[%s2323_s3 + $0x144] sm:$0xf0] }
  0x18   :  { %v1288_v28 = vor.u32 %v1512_v27, %v1287_v25  ;;  %v1279_v31 = vld [vmem:[%s2323_s3 + $0x1c0] sm:$0xf]  ;;  %v1510_v33 = vld [vmem:[%s2323_s3 + $0x1c4] sm:$0xf0]  ;;  %v1207_v35 = vld [vmem:[%s2323_s3 + $0x130] sm:$0xf] }
  0x19   :  { %766 = vmatpush.bf16.msrb.mxu0 %v1348_v41  ;;  %785 = vmatpush.bf16.msrb.mxu1 %v1412_v43  ;;  %v1280_v34 = vor.u32 %v1510_v33, %v1279_v31  ;;  %v1492_v36 = vld [vmem:[%s2323_s3 + $0x134] sm:$0xf0]  ;;  %v1271_v37 = vld [vmem:[%s2323_s3 + $0x1b0] sm:$0xf]  ;;  %v1490_v43 = vld [vmem:[%s2323_s3 + $0x124] sm:$0xf0] }
  0x1a   :  { %v1208_v39 = vor.u32 %v1492_v36, %v1207_v35  ;;  %v1508_v40 = vld [vmem:[%s2323_s3 + $0x1b4] sm:$0xf0]  ;;  %v1263_v44 = vld [vmem:[%s2323_s3 + $0x1a0] sm:$0xf]  ;;  %v1506_v48 = vld [vmem:[%s2323_s3 + $0x1a4] sm:$0xf0] }
  0x1b   :  { %1127 = vmatmul.msk.f32.gmra.mxu0 %vm42_vm1, %v33_v14  ;;  %1140 = vmatmul.msk.f32.gmra.mxu1 %vm42_vm1, %v33_v14  ;;  %v1240_v14 = vor.u32 %v1500_v12, %v1239_v11  ;;  %v1272_v41 = vor.u32 %v1508_v40, %v1271_v37  ;;  %v1504_v56 = vld [vmem:[%s2323_s3 + $0x194] sm:$0xf0]  ;;  %v1183_v59 = vld [vmem:[%s2323_s3 + $0x100] sm:$0xf]  ;;  %v1502_v2 = vld [vmem:[%s2323_s3 + $0x184] sm:$0xf0] }
  0x1c   :  { %822 = vperm.xlu0 %1534, %v804_v15   ;;  %807 = vperm.xlu1 %1535, %v801_v16   ;;  %v1516_v15 = vld [vmem:[%s2323_s3 + $0x1f4] sm:$0xf0]  ;;  %v1241_v11 = vld [vmem:[%s2323_s3 + $0x178] sm:$0xf0]  ;;  %v1515_v12 = vld [vmem:[%s2323_s3 + $0x1f4] sm:$0xf] }
  0x1d   :  { %767 = vmatpush.bf16.msrb.mxu0 %v1340_v47  ;;  %786 = vmatpush.bf16.msrb.mxu1 %v1404_v50  ;;  %v1304_v16 = vor.u32 %v1516_v15, %v1303_v13  ;;  %v1264_v50 = vor.u32 %v1506_v48, %v1263_v44  ;;  %v1305_v15 = vld [vmem:[%s2323_s3 + $0x1f8] sm:$0xf0]  ;;  %v1513_v19 = vld [vmem:[%s2323_s3 + $0x1e4] sm:$0xf]  ;;  %v1297_v23 = vld [vmem:[%s2323_s3 + $0x1e8] sm:$0xf0] }
  0x1e   :  { %812 = vperm.xlu2 %1536, %v802_v62   ;;  %489 = vmatpush.bf16.msra.mxu2 %v1240_v14  ;;  %v1300_v24 = vor.u32 %v1513_v19, %v1297_v23  ;;  %v1495_v25 = vld [vmem:[%s2323_s3 + $0x154] sm:$0xf]  ;;  %v1493_v33 = vld [vmem:[%s2323_s3 + $0x144] sm:$0xf]  ;;  %v1281_v40 = vld [vmem:[%s2323_s3 + $0x1c8] sm:$0xf0] }
  0x1f   :  { %508 = vmatpush.bf16.msra.mxu3 %v1304_v16  ;;  %v1308_v16 = vor.u32 %v1515_v12, %v1305_v15  ;;  %v1511_v27 = vld [vmem:[%s2323_s3 + $0x1d4] sm:$0xf]  ;;  %v1509_v35 = vld [vmem:[%s2323_s3 + $0x1c4] sm:$0xf]  ;;  %v1209_v48 = vld [vmem:[%s2323_s3 + $0x138] sm:$0xf0] }
  0x20   :  { %v1284_v44 = vor.u32 %v1509_v35, %v1281_v40  ;;  %v1367_v23 = vld [vmem:[%s2323_s3 + $0x70] sm:$0xf] }
  0x21   :  { %768 = vmatpush.bf16.msrb.mxu0 %v1332_v58  ;;  %787 = vmatpush.bf16.msrb.mxu1 %v1396_v60  ;;  %v1486_v60 = vld [vmem:[%s2323_s3 + $0x104] sm:$0xf0] }
  0x22   :  { %v1184_v1 = vor.u32 %v1486_v60, %v1183_v59  ;;  %v1265_v59 = vld [vmem:[%s2323_s3 + $0x1a8] sm:$0xf0] }
  0x23   :  { %1128 = vmatmul.msk.f32.gmra.mxu0 %vm42_vm1, %v34_v17  ;;  %1141 = vmatmul.msk.f32.gmra.mxu1 %vm42_vm1, %v34_v17  ;;  %v1231_v17 = vld [vmem:[%s2323_s3 + $0x160] sm:$0xf] }
  0x24   :  { %v1232_v20 = vor.u32 %v1498_v18, %v1231_v17  ;;  %509 = vmatpush.bf16.msra.mxu3 %v1296_v22  ;;  %v1497_v17 = vld [vmem:[%s2323_s3 + $0x164] sm:$0xf]  ;;  %v1233_v18 = vld [vmem:[%s2323_s3 + $0x168] sm:$0xf0] }
  0x25   :  { %769 = vmatpush.bf16.msrb.mxu0 %v1324_v3  ;;  %788 = vmatpush.bf16.msrb.mxu1 %v1388_v4  ;;  %v1236_v22 = vor.u32 %v1497_v17, %v1233_v18 }
  0x26   :  { %490 = vmatpush.bf16.msra.mxu2 %v1232_v20 }
  0x28   :  { %510 = vmatpush.bf16.msra.mxu3 %v1288_v28 }
  0x29   :  { %770 = vmatpush.bf16.msrb.mxu0 %v1316_v8  ;;  %789 = vmatpush.bf16.msrb.mxu1 %v1380_v10  ;;  %v1499_v10 = vld [vmem:[%s2323_s3 + $0x174] sm:$0xf] }
  0x2a   :  { %491 = vmatpush.bf16.msra.mxu2 %v1224_v26  ;;  %v1244_v14 = vor.u32 %v1499_v10, %v1241_v11  ;;  %v1225_v26 = vld [vmem:[%s2323_s3 + $0x158] sm:$0xf0]  ;;  %v1501_v10 = vld [vmem:[%s2323_s3 + $0x184] sm:$0xf]  ;;  %v1249_v11 = vld [vmem:[%s2323_s3 + $0x188] sm:$0xf0] }
  0x2b   :  { %1129 = vmatmul.msk.f32.gmra.mxu0 %vm42_vm1, %v35_v29  ;;  %1142 = vmatmul.msk.f32.gmra.mxu1 %vm42_vm1, %v35_v29  ;;  %v1215_v29 = vld [vmem:[%s2323_s3 + $0x140] sm:$0xf]  ;;  %v1228_v28 = vor.u32 %v1495_v25, %v1225_v26 }
  0x2c   :  { %v1216_v32 = vor.u32 %v1494_v30, %v1215_v29  ;;  %511 = vmatpush.bf16.msra.mxu3 %v1280_v34  ;;  %v1289_v29 = vld [vmem:[%s2323_s3 + $0x1d8] sm:$0xf0]  ;;  %v1217_v34 = vld [vmem:[%s2323_s3 + $0x148] sm:$0xf0] }
  0x2d   :  { %v1292_v30 = vor.u32 %v1511_v27, %v1289_v29  ;;  %v1359_v27 = vld [vmem:[%s2323_s3 + $0x60] sm:$0xf] }
  0x2e   :  { %492 = vmatpush.bf16.msra.mxu2 %v1216_v32  ;;  %v1423_v29 = vld [vmem:[%s2323_s3 + $0xe0] sm:$0xf] }
  0x30   :  { %512 = vmatpush.bf16.msra.mxu3 %v1272_v41 }
  0x32   :  { %493 = vmatpush.bf16.msra.mxu2 %v1208_v39  ;;  %v1220_v39 = vor.u32 %v1493_v33, %v1217_v34  ;;  %v1351_v33 = vld [vmem:[%s2323_s3 + $0x50] sm:$0xf]  ;;  %v1464_v34 = vld [vmem:[%s2323_s3 + $0x54] sm:$0xf0] }
  0x33   :  { %1130 = vmatmul.msk.f32.gmra.mxu0 %vm42_vm1, %v36_v42  ;;  %1143 = vmatmul.msk.f32.gmra.mxu1 %vm42_vm1, %v36_v42  ;;  %v1199_v42 = vld [vmem:[%s2323_s3 + $0x120] sm:$0xf] }
  0x34   :  { %v1200_v47 = vor.u32 %v1490_v43, %v1199_v42  ;;  %513 = vmatpush.bf16.msra.mxu3 %v1264_v50  ;;  %v1507_v50 = vld [vmem:[%s2323_s3 + $0x1b4] sm:$0xf] }
  0x36   :  { %494 = vmatpush.bf16.msra.mxu2 %v1200_v47  ;;  %v1491_v47 = vld [vmem:[%s2323_s3 + $0x134] sm:$0xf] }
  0x3b   :  { %1131 = vmatmul.msk.f32.gmra.mxu0 %vm42_vm1, %v37_v51  ;;  %1144 = vmatmul.msk.f32.gmra.mxu1 %vm42_vm1, %v37_v51  ;;  %v1191_v51 = vld [vmem:[%s2323_s3 + $0x110] sm:$0xf] }
  0x43   :  { %1132 = vmatmul.msk.f32.gmra.mxu0 %vm42_vm1, %v38_v52  ;;  %1145 = vmatmul.msk.f32.gmra.mxu1 %vm42_vm1, %v38_v52  ;;  %v1488_v52 = vld [vmem:[%s2323_s3 + $0x114] sm:$0xf0] }
  0x44   :  { %v1192_v55 = vor.u32 %v1488_v52, %v1191_v51  ;;  %v1212_v51 = vor.u32 %v1491_v47, %v1209_v48  ;;  %v1273_v52 = vld [vmem:[%s2323_s3 + $0x1b8] sm:$0xf0] }
  0x46   :  { %495 = vmatpush.bf16.msra.mxu2 %v1192_v55  ;;  %v1489_v55 = vld [vmem:[%s2323_s3 + $0x124] sm:$0xf] }
  0x4a   :  { %496 = vmatpush.bf16.msra.mxu2 %v1184_v1  ;;  %v1503_v1 = vld [vmem:[%s2323_s3 + $0x194] sm:$0xf] }
  0x4b   :  { %1133 = vmatmul.msk.f32.gmra.mxu0 %vm42_vm1, %v39_v53  ;;  %1146 = vmatmul.msk.f32.gmra.mxu1 %vm42_vm1, %v39_v53  ;;  %v1255_v53 = vld [vmem:[%s2323_s3 + $0x190] sm:$0xf] }
  0x4c   :  { %v1256_v57 = vor.u32 %v1504_v56, %v1255_v53  ;;  %v1276_v53 = vor.u32 %v1507_v50, %v1273_v52  ;;  %v1201_v56 = vld [vmem:[%s2323_s3 + $0x128] sm:$0xf0] }
  0x4e   :  { %514 = vmatpush.bf16.msra.mxu3 %v1256_v57  ;;  %527 = vmatpush.bf16.msrb.mxu2 %v1244_v14  ;;  %v1505_v57 = vld [vmem:[%s2323_s3 + $0x1a4] sm:$0xf]  ;;  %v1252_v14 = vor.u32 %v1501_v10, %v1249_v11  ;;  %v1383_v10 = vld [vmem:[%s2323_s3 + $0x90] sm:$0xf]  ;;  %v1472_v11 = vld [vmem:[%s2323_s3 + $0x94] sm:$0xf0] }
  0x4f   :  { %v1268_v60 = vor.u32 %v1505_v57, %v1265_v59  ;;  %v1335_v59 = vld [vmem:[%s2323_s3 + $0x30] sm:$0xf] }
  0x52   :  { %528 = vmatpush.bf16.msrb.mxu2 %v1236_v22 }
  0x53   :  { %1134 = vmatmul.msk.f32.gmra.mxu0 %vm42_vm1, %v40_v54  ;;  %1147 = vmatmul.msk.f32.gmra.mxu1 %vm42_vm1, %v40_v54 }
  0x56   :  { %529 = vmatpush.bf16.msrb.mxu2 %v1228_v28  ;;  %v1466_v28 = vld [vmem:[%s2323_s3 + $0x64] sm:$0xf0] }
  0x5a   :  { %530 = vmatpush.bf16.msrb.mxu2 %v1220_v39  ;;  %v1352_v39 = vor.u32 %v1464_v34, %v1351_v33 }
  0x5b   :  { %1148 = vmatmul.msk.f32.gmra.mxu1 %vm42_vm1, %v41_v61  ;;  %1135 = vmatmul.msk.f32.gmra.mxu0 %vm42_vm1, %v41_v61  ;;  %v1247_v61 = vld [vmem:[%s2323_s3 + $0x180] sm:$0xf] }
  0x5c   :  { %v1248_v6 = vor.u32 %v1502_v2, %v1247_v61  ;;  %v1487_v61 = vld [vmem:[%s2323_s3 + $0x114] sm:$0xf]  ;;  %v1257_v2 = vld [vmem:[%s2323_s3 + $0x198] sm:$0xf0] }
  0x5e   :  { %515 = vmatpush.bf16.msra.mxu3 %v1248_v6  ;;  %531 = vmatpush.bf16.msrb.mxu2 %v1212_v51  ;;  %v1185_v6 = vld [vmem:[%s2323_s3 + $0x108] sm:$0xf0] }
  0x60   :  { %v199_v38 = vpop.permute.xlu2 %198 }
  0x62   :  { %546 = vmatpush.bf16.msrb.mxu3 %v1308_v16 }
  0x66   :  { %547 = vmatpush.bf16.msrb.mxu3 %v1300_v24  ;;  %v1468_v24 = vld [vmem:[%s2323_s3 + $0x74] sm:$0xf0] }
  0x67   :  { %v1368_v25 = vor.u32 %v1468_v24, %v1367_v23 }
  0x68   :  { %v204_v58 = vpop.permute.xlu2 %203 }
  0x6a   :  { %548 = vmatpush.bf16.msrb.mxu3 %v1292_v30  ;;  %v1360_v30 = vor.u32 %v1466_v28, %v1359_v27 }
  0x6e   :  { %549 = vmatpush.bf16.msrb.mxu3 %v1284_v44  ;;  %v1478_v44 = vld [vmem:[%s2323_s3 + $0xc4] sm:$0xf0] }
  0x72   :  { %550 = vmatpush.bf16.msrb.mxu3 %v1276_v53 }
  0x76   :  { %v1890_v49 = vpop.permute.xlu0 %266  ;;  %v1901_v54 = vpop.permute.xlu1 %276  ;;  %551 = vmatpush.bf16.msrb.mxu3 %v1268_v60  ;;  %v1460_v60 = vld [vmem:[%s2323_s3 + $0x34] sm:$0xf0] }
  0x7e   :  { %v1918_v7 = vpop.permute.xlu0 %271  ;;  %v1933_v13 = vpop.permute.xlu1 %281 }
  0x80   :  { %v103_v45 = vpop.f32.mrf.mxu0  ;;  %v156_v46 = vpop.f32.mrf.mxu1 }
  0x81   :  { %v216_v62 = vadd.f32 %v199_v38, %v103_v45  ;;  %v217_v3 = vadd.f32 %v199_v38, %v156_v46 }
  0x86   :  { %v209_v31 = vpop.permute.xlu0 %208  ;;  %v214_v32 = vpop.permute.xlu1 %213 }
  0x88   :  { %v106_v63 = vpop.f32.mrf.mxu0  ;;  %v159_v0 = vpop.f32.mrf.mxu1 }
  0x89   :  { %v218_v4 = vadd.f32 %v204_v58, %v106_v63  ;;  %v219_v5 = vadd.f32 %v204_v58, %v159_v0  ;;  %v1204_v58 = vor.u32 %v1489_v55, %v1201_v56 }
  0x8b   :  { %v1920_v8 = vpack.c.bf16 %v218_v4, %v216_v62  ;;  %v1922_v9 = vpack.c.bf16 %v219_v5, %v217_v3  ;;  %v1193_v62 = vld [vmem:[%s2323_s3 + $0x118] sm:$0xf0]  ;;  %532 = vmatpush.bf16.msrb.mxu2 %v1204_v58  ;;  %v1260_v4 = vor.u32 %v1503_v1, %v1257_v2  ;;  %v1485_v5 = vld [vmem:[%s2323_s3 + $0x104] sm:$0xf]  ;;  %v1391_v1 = vld [vmem:[%s2323_s3 + $0xa0] sm:$0xf] }
  0x8c   :  { %v1196_v3 = vor.u32 %v1487_v61, %v1193_v62  ;;  %v1188_v12 = vor.u32 %v1485_v5, %v1185_v6  ;;  %v1336_v61 = vor.u32 %v1460_v60, %v1335_v59  ;;  %v1319_v5 = vld [vmem:[%s2323_s3 + $0x10] sm:$0xf]  ;;  %v1456_v6 = vld [vmem:[%s2323_s3 + $0x14] sm:$0xf0]  ;;  %v818_v59 = vpop.permute.xlu2 %817 }
  0x8d   :  { %771 = vmatmul.bf16.vlgmr.msrb.gmra.mxu0 %v1920_v8  ;;  %790 = vmatmul.bf16.vlgmr.msrb.gmra.mxu1 %v1922_v9 }
  0x8e   :  { %552 = vmatpush.bf16.msrb.mxu3 %v1260_v4 }
  0x8f   :  { %533 = vmatpush.bf16.msrb.mxu2 %v1196_v3  ;;  %v1474_v3 = vld [vmem:[%s2323_s3 + $0xa4] sm:$0xf0] }
  0x90   :  { %v109_v20 = vpop.f32.mrf.mxu0  ;;  %v162_v21 = vpop.f32.mrf.mxu1  ;;  %v1392_v4 = vor.u32 %v1474_v3, %v1391_v1 }
  0x91   :  { %v220_v36 = vadd.f32 %v209_v31, %v109_v20  ;;  %v221_v41 = vadd.f32 %v209_v31, %v162_v21  ;;  %v1482_v31 = vld [vmem:[%s2323_s3 + $0xe4] sm:$0xf0] }
  0x92   :  { %553 = vmatpush.bf16.msrb.mxu3 %v1252_v14  ;;  %v1384_v14 = vor.u32 %v1472_v11, %v1383_v10 }
  0x93   :  { %534 = vmatpush.bf16.msrb.mxu2 %v1188_v12  ;;  %v1320_v12 = vor.u32 %v1456_v6, %v1319_v5  ;;  %v808_v6 = vpop.permute.xlu1 %807 }
  0x98   :  { %v112_v37 = vpop.f32.mrf.mxu0  ;;  %v165_v38 = vpop.f32.mrf.mxu1 }
  0x99   :  { %v222_v42 = vadd.f32 %v214_v32, %v112_v37  ;;  %v223_v43 = vadd.f32 %v214_v32, %v165_v38  ;;  %v1424_v32 = vor.u32 %v1482_v31, %v1423_v29  ;;  %v1415_v37 = vld [vmem:[%s2323_s3 + $0xd0] sm:$0xf]  ;;  %v1480_v38 = vld [vmem:[%s2323_s3 + $0xd4] sm:$0xf0] }
  0x9a   :  { %v1416_v40 = vor.u32 %v1480_v38, %v1415_v37 }
  0x9b   :  { %v1976_v45 = vpack.c.bf16 %v222_v42, %v220_v36  ;;  %v1978_v46 = vpack.c.bf16 %v223_v43, %v221_v41  ;;  %v1343_v41 = vld [vmem:[%s2323_s3 + $0x40] sm:$0xf]  ;;  %v1462_v42 = vld [vmem:[%s2323_s3 + $0x44] sm:$0xf0] }
  0x9c   :  { %v1407_v43 = vld [vmem:[%s2323_s3 + $0xc0] sm:$0xf]  ;;  %v1344_v47 = vor.u32 %v1462_v42, %v1343_v41 }
  0x9d   :  { %776 = vmatmul.bf16.gmra.mxu0 %v1976_v45  ;;  %795 = vmatmul.bf16.gmra.mxu1 %v1978_v46  ;;  %v1408_v48 = vor.u32 %v1478_v44, %v1407_v43 }
  0xa0   :  { %v115_v63 = vpop.f32.mrf.mxu0  ;;  %v168_v0 = vpop.f32.mrf.mxu1 }
  0xa1   :  { %v284_v17 = vadd.f32 %v1890_v49, %v115_v63  ;;  %v285_v18 = vadd.f32 %v1890_v49, %v168_v0  ;;  %v1431_v49 = vld [vmem:[%s2323_s3 + $0xf0] sm:$0xf]  ;;  %v1327_v63 = vld [vmem:[%s2323_s3 + $0x20] sm:$0xf]  ;;  %v1458_v0 = vld [vmem:[%s2323_s3 + $0x24] sm:$0xf0] }
  0xa2   :  { %v1328_v2 = vor.u32 %v1458_v0, %v1327_v63 }
  0xa8   :  { %v118_v15 = vpop.f32.mrf.mxu0  ;;  %v171_v16 = vpop.f32.mrf.mxu1 }
  0xa9   :  { %v286_v19 = vadd.f32 %v1918_v7, %v118_v15  ;;  %v287_v20 = vadd.f32 %v1918_v7, %v171_v16  ;;  %v1484_v7 = vld [vmem:[%s2323_s3 + $0xf4] sm:$0xf0]  ;;  %v1311_v15 = vld [vmem:[%s2323_s3] sm:$0xf]  ;;  %v1454_v16 = vld [vmem:[%s2323_s3 + $0x4] sm:$0xf0] }
  0xaa   :  { %v1432_v26 = vor.u32 %v1484_v7, %v1431_v49 }
  0xab   :  { %v2034_v21 = vpack.c.bf16 %v286_v19, %v284_v17  ;;  %v2036_v22 = vpack.c.bf16 %v287_v20, %v285_v18  ;;  %v1375_v17 = vld [vmem:[%s2323_s3 + $0x80] sm:$0xf]  ;;  %v1470_v18 = vld [vmem:[%s2323_s3 + $0x84] sm:$0xf0]  ;;  %v1312_v19 = vor.u32 %v1454_v16, %v1311_v15 }
  0xac   :  { %v1376_v20 = vor.u32 %v1470_v18, %v1375_v17 }
  0xad   :  { %497 = vmatmul.bf16.vlgmr.msra.gmra.mxu2 %v2034_v21  ;;  %516 = vmatmul.bf16.vlgmr.msra.gmra.mxu3 %v2036_v22 }
  0xae   :  { %725 = vmatpush.bf16.msra.mxu2 %v1368_v25  ;;  %744 = vmatpush.bf16.msra.mxu3 %v1432_v26 }
  0xb0   :  { %v121_v35 = vpop.f32.mrf.mxu0  ;;  %v174_v36 = vpop.f32.mrf.mxu1 }
  0xb1   :  { %v288_v52 = vadd.f32 %v1901_v54, %v121_v35  ;;  %v289_v53 = vadd.f32 %v1901_v54, %v174_v36  ;;  %v1399_v54 = vld [vmem:[%s2323_s3 + $0xb0] sm:$0xf] }
  0xb2   :  { %726 = vmatpush.bf16.msra.mxu2 %v1360_v30  ;;  %745 = vmatpush.bf16.msra.mxu3 %v1424_v32 }
  0xb6   :  { %727 = vmatpush.bf16.msra.mxu2 %v1352_v39  ;;  %746 = vmatpush.bf16.msra.mxu3 %v1416_v40 }
  0xb8   :  { %v124_v50 = vpop.f32.mrf.mxu0  ;;  %v177_v51 = vpop.f32.mrf.mxu1 }
  0xb9   :  { %v290_v55 = vadd.f32 %v1933_v13, %v124_v50  ;;  %v291_v56 = vadd.f32 %v1933_v13, %v177_v51  ;;  %v1476_v13 = vld [vmem:[%s2323_s3 + $0xb4] sm:$0xf0]  ;;  %s1578_s3 = smov 112  }
  0xba   :  { %728 = vmatpush.bf16.msra.mxu2 %v1344_v47  ;;  %747 = vmatpush.bf16.msra.mxu3 %v1408_v48  ;;  %v1400_v62 = vor.u32 %v1476_v13, %v1399_v54  ;;  %v823_v13 = vpop.permute.xlu0 %822 }
  0xbb   :  { %v294_v57 = vpack.c.bf16 %v290_v55, %v288_v52  ;;  %v295_v58 = vpack.c.bf16 %v291_v56, %v289_v53 }
  0xbd   :  { %502 = vmatmul.bf16.gmra.mxu2 %v294_v57  ;;  %521 = vmatmul.bf16.gmra.mxu3 %v295_v58 }
  0xbe   :  { %729 = vmatpush.bf16.msra.mxu2 %v1336_v61  ;;  %748 = vmatpush.bf16.msra.mxu3 %v1400_v62 }
  0xc0   :  { %v2146_v23 = vpop.f32.mrf.mxu0  ;;  %v2148_v24 = vpop.f32.mrf.mxu1 }
  0xc2   :  { %730 = vmatpush.bf16.msra.mxu2 %v1328_v2  ;;  %749 = vmatpush.bf16.msra.mxu3 %v1392_v4 }
  0xc6   :  { %731 = vmatpush.bf16.msra.mxu2 %v1320_v12  ;;  %750 = vmatpush.bf16.msra.mxu3 %v1384_v14 }
  0xc8   :  { %v2150_v49 = vpop.f32.mrf.mxu0  ;;  %v2152_v25 = vpop.f32.mrf.mxu1 }
  0xca   :  { %732 = vmatpush.bf16.msra.mxu2 %v1312_v19  ;;  %751 = vmatpush.bf16.msra.mxu3 %v1376_v20 }
  0xcd   :  { %535 = vmatmul.bf16.vlgmr.msrb.gmra.mxu2 %v2034_v21  ;;  %554 = vmatmul.bf16.vlgmr.msrb.gmra.mxu3 %v2036_v22 }
  0xd0   :  { %v2154_v26 = vpop.f32.mrf.mxu0 }
  0xdd   :  { %540 = vmatmul.bf16.gmra.mxu2 %v294_v57  ;;  %559 = vmatmul.bf16.gmra.mxu3 %v295_v58 }
  0xed   :  { %733 = vmatmul.bf16.vlgmr.msra.gmra.mxu2 %v1920_v8  ;;  %752 = vmatmul.bf16.vlgmr.msra.gmra.mxu3 %v1922_v9  ;;  %v2156_v9 = vpop.f32.mrf.mxu1 }
  0xf5   :  { %v2162_v30 = vpop.f32.mrf.mxu1 }
  0xfd   :  { %738 = vmatmul.bf16.gmra.mxu2 %v1976_v45  ;;  %757 = vmatmul.bf16.gmra.mxu3 %v1978_v46  ;;  %v2158_v46 = vpop.f32.mrf.mxu0 }
 0x10a   :  { %v772_v33 = vpop.f32.mrf.mxu0  ;;  %v791_v34 = vpop.f32.mrf.mxu1 }
 0x112   :  { %v774_v37 = vpop.f32.mrf.mxu0  ;;  %v793_v38 = vpop.f32.mrf.mxu1 }
 0x11a   :  { %v777_v41 = vpop.f32.mrf.mxu0  ;;  %v796_v47 = vpop.f32.mrf.mxu1 }
 0x122   :  { %v779_v56 = vpop.f32.mrf.mxu0  ;;  %v798_v60 = vpop.f32.mrf.mxu1 }
 0x130   :  { %v498_v21 = vpop.f32.mrf.mxu2  ;;  %v517_v22 = vpop.f32.mrf.mxu3 }
 0x131   :  { %v518_v7 = vadd.f32 %v517_v22, %v498_v21 }
 0x138   :  { %v500_v8 = vpop.f32.mrf.mxu2  ;;  %v519_v27 = vpop.f32.mrf.mxu3 }
 0x139   :  { %v520_v16 = vadd.f32 %v519_v27, %v500_v8 }
 0x140   :  { %v503_v45 = vpop.f32.mrf.mxu2  ;;  %v522_v28 = vpop.f32.mrf.mxu3 }
 0x141   :  { %v2160_v29 = vadd.f32 %v522_v28, %v503_v45  ;;  %v813_v28 = vpop.permute.xlu2 %812 }
 0x148   :  { %v2164_v31 = vpop.f32.mrf.mxu2  ;;  %v2166_v32 = vpop.f32.mrf.mxu3 }
 0x150   :  { %v536_v35 = vpop.f32.mrf.mxu2  ;;  %v555_v36 = vpop.f32.mrf.mxu3 }
 0x151   :  { %v556_v50 = vadd.f32 %v555_v36, %v536_v35 }
 0x153   :  { %v773_v57 = vadd.f32 %v772_v33, %v556_v50 }
 0x155   :  { %v792_v62 = vadd.f32 %v791_v34, %v773_v57 }
 0x157   :  { %v826_v10 = vadd.f32 %v808_v6, %v792_v62 }
 0x158   :  { %v538_v39 = vpop.f32.mrf.mxu2  ;;  %v557_v40 = vpop.f32.mrf.mxu3 }
 0x159   :  { %v558_v63 = vadd.f32 %v557_v40, %v538_v39  ;;  %v834_v17 = vmax.f32 %v826_v10, 0.0 }
 0x15b   :  { %v775_v11 = vadd.f32 %v774_v37, %v558_v63 }
 0x15d   :  { %v794_v18 = vadd.f32 %v793_v38, %v775_v11 }
 0x15f   :  { %v828_v33 = vadd.f32 %v813_v28, %v794_v18 }
 0x160   :  { %v541_v42 = vpop.f32.mrf.mxu2  ;;  %v560_v43 = vpop.f32.mrf.mxu3 }
 0x161   :  { %v561_v44 = vadd.f32 %v560_v43, %v541_v42  ;;  %v836_v35 = vmax.f32 %v828_v33, 0.0 }
 0x163   :  { %v778_v48 = vadd.f32 %v777_v41, %v561_v44 }
 0x165   :  { %v797_v53 = vadd.f32 %v796_v47, %v778_v48 }
 0x167   :  { %v830_v54 = vadd.f32 %v818_v59, %v797_v53 }
 0x168   :  { %v543_v51 = vpop.f32.mrf.mxu2  ;;  %v562_v52 = vpop.f32.mrf.mxu3 }
 0x169   :  { %v563_v55 = vadd.f32 %v562_v52, %v543_v51  ;;  %v838_v3 = vmax.f32 %v830_v54, 0.0  ;;  %v525_v51 = vadd.f32 %v2166_v32, %v2164_v31 }
 0x16b   :  { %v780_v58 = vadd.f32 %v779_v56, %v563_v55 }
 0x16d   :  { %v799_v61 = vadd.f32 %v798_v60, %v780_v58 }
 0x16f   :  { %v832_v0 = vadd.f32 %v823_v13, %v799_v61 }
 0x170   :  { %v734_v1 = vpop.f32.mrf.mxu2  ;;  %v753_v2 = vpop.f32.mrf.mxu3 }
 0x171   :  { %v840_v4 = vmax.f32 %v832_v0, 0.0  ;;  %v735_v5 = vadd.f32 %v734_v1, %v518_v7 }
 0x173   :  { %v754_v12 = vadd.f32 %v753_v2, %v735_v5  ;;  %v1537_v14 = vpack.i.bf16 %v840_v4, %v838_v3  ;;  %v1552_v2 = vpack.i.bf16 %v836_v35, %v834_v17  ;;  %v841_v5 = vlaneseq }
 0x175   :  { %v825_v15 = vadd.f32 %v808_v6, %v754_v12  ;;  %1538 = vrot.lane.b32.xlu1 %v1537_v14, %s1578_s3  ;;  %v2195_v6 = vand.u32 127, %v841_v5 }
 0x177   :  { %v833_v19 = vmax.f32 %v825_v15, 0.0  ;;  %v843_v10 = vadd.s32 128, %v2195_v6  ;;  %vm927_vm2 = vcmp.lt.s32.totalorder %v2195_v6, 112  ;;  %vm884_vm4 = vcmp.lt.s32.totalorder %v2195_v6, 16 }
 0x178   :  { %v736_v20 = vpop.f32.mrf.mxu2  ;;  %v755_v21 = vpop.f32.mrf.mxu3  ;;  %vm893_vm5 = vcmp.ge.s32.totalorder %v2195_v6, 16 }
 0x179   :  { %v907_v22 = vpack.c.bf16 %v834_v17, %v833_v19  ;;  %v737_v45 = vadd.f32 %v736_v20, %v520_v16 }
 0x17b   :  { %v756_v7 = vadd.f32 %v755_v21, %v737_v45  ;;  %v974_v8 = vunpack.c.l.b16 %v907_v22  ;;  %v975_v43 = vunpack.c.h.b16 %v907_v22 }
 0x17d   :  { %v827_v34 = vadd.f32 %v813_v28, %v756_v7 }
 0x17f   :  { %v835_v36 = vmax.f32 %v827_v34, 0.0 }
 0x180   :  { %v739_v37 = vpop.f32.mrf.mxu2  ;;  %v758_v39 = vpop.f32.mrf.mxu3 }
 0x181   :  { %v908_v40 = vpack.c.bf16 %v836_v35, %v835_v36  ;;  %v740_v41 = vadd.f32 %v739_v37, %v2160_v29  ;;  %v1542_v42 = vpack.i.bf16 %v835_v36, %v833_v19 }
 0x183   :  { %v759_v27 = vadd.f32 %v758_v39, %v740_v41  ;;  %1543 = vrot.lane.b32.xlu2 %v1542_v42, %s1578_s3  ;;  %v976_v38 = vunpack.c.l.b16 %v908_v40  ;;  %v977_v44 = vunpack.c.h.b16 %v908_v40 }
 0x185   :  { %v829_v47 = vadd.f32 %v818_v59, %v759_v27  ;;  %v2171_v48 = vpack.c.b16 %v976_v38, %v974_v8  ;;  %v2173_v50 = vpack.c.b16 %v977_v44, %v975_v43  ;;  %v1069_v59 = vld [vmem:[%s2324_s6] sm:$0xff] }
 0x187   :  { %v837_v52 = vmax.f32 %v829_v47, 0.0 }
 0x188   :  { %v741_v53 = vpop.f32.mrf.mxu2  ;;  %v760_v56 = vpop.f32.mrf.mxu3 }
 0x189   :  { %v909_v55 = vpack.c.bf16 %v838_v3, %v837_v52  ;;  %v742_v29 = vadd.f32 %v741_v53, %v525_v51  ;;  %v1071_v3 = vld [vmem:[%s2324_s6 + $0x10] sm:$0xff] }
 0x18b   :  { %v761_v57 = vadd.f32 %v760_v56, %v742_v29  ;;  %1558 = vrot.lane.b32.xlu2 %v1537_v14, %s1579_s17  ;;  %v978_v31 = vunpack.c.l.b16 %v909_v55  ;;  %v979_v62 = vunpack.c.h.b16 %v909_v55  ;;  %v855_v14 = vand.u32 127, %v843_v10 }
 0x18d   :  { %v831_v58 = vadd.f32 %v823_v13, %v761_v57  ;;  %v1072_v13 = vld [vmem:[%s2324_s6 + $0x18] sm:$0xff]  ;;  %vm2199_vm3 = vcmp.lt.s32.totalorder %v855_v14, 112  ;;  %vm2237_vm6 = vcmp.ge.s32.totalorder %v855_v14, 16 }
 0x18f   :  { %v839_v60 = vmax.f32 %v831_v58, 0.0 }
 0x191   :  { %v910_v54 = vpack.c.bf16 %v840_v4, %v839_v60  ;;  %v1547_v61 = vpack.i.bf16 %v839_v60, %v837_v52  ;;  %v1070_v4 = vld [vmem:[%s2324_s6 + $0x8] sm:$0xff] }
 0x193   :  { %1548 = vrot.lane.b32.xlu0 %v1547_v61, %s1578_s3  ;;  %1075 = vperm.xlu2 %1536, %v1069_v59   ;;  %v980_v32 = vunpack.c.l.b16 %v910_v54  ;;  %v981_v63 = vunpack.c.h.b16 %v910_v54 }
 0x194   :  { %1568 = vrot.lane.b32.xlu1 %v1547_v61, %s1579_s17 }
 0x195   :  { %v2181_v0 = vpack.c.b16 %v980_v32, %v978_v31  ;;  %v2183_v1 = vpack.c.b16 %v981_v63, %v979_v62 }
 0x19b   :  { %1090 = vperm.xlu2 %1536, %v1072_v13   ;;  %1553 = vrot.lane.b32.xlu0 %v1552_v2, %s1578_s3 }
 0x19c   :  { %1573 = vrot.lane.b32.xlu1 %v1552_v2, %s1579_s17 }
 0x1a3   :  { %1563 = vrot.lane.b32.xlu0 %v1542_v42, %s1579_s17 }
 0x1a4   :  { %1085 = vperm.xlu1 %1535, %v1071_v3  }
 0x1ab   :  { %1080 = vperm.xlu0 %1534, %v1070_v4  }
 0x1dd   :  { %v1544_v11 = vpop.permute.xlu2 %1543 }
 0x1de   :  { %v1546_v41 = vunpack.i.h.bf16 %v1544_v11  ;;  %v1545_v27 = vunpack.i.l.bf16 %v1544_v11 }
 0x1e5   :  { %v1559_v37 = vpop.permute.xlu2 %1558 }
 0x1e6   :  { %v1561_v38 = vunpack.i.h.bf16 %v1559_v37  ;;  %v1560_v51 = vunpack.i.l.bf16 %v1559_v37 }
 0x1e7   :  { %v1539_v12 = vpop.permute.xlu1 %1538 }
 0x1e8   :  { %v1541_v17 = vunpack.i.h.bf16 %v1539_v12  ;;  %v1540_v18 = vunpack.i.l.bf16 %v1539_v12 }
 0x205   :  { %v1549_v16 = vpop.permute.xlu0 %1548 }
 0x206   :  { %v1551_v19 = vunpack.i.h.bf16 %v1549_v16  ;;  %v1550_v20 = vunpack.i.l.bf16 %v1549_v16  ;;  %v1569_v33 = vpop.permute.xlu1 %1568 }
 0x207   :  { %v1571_v29 = vunpack.i.h.bf16 %v1569_v33  ;;  %v1570_v56 = vunpack.i.l.bf16 %v1569_v33 }
 0x208   :  { %v930_v21 = vsel %vm927_vm2, %v1550_v20, %v1540_v18  ;;  %v931_v22 = vsel %vm927_vm2, %v1551_v19, %v1541_v17  ;;  %v934_v45 = vsel %vm927_vm2, %v1540_v18, %v1550_v20  ;;  %v935_v28 = vsel %vm927_vm2, %v1541_v17, %v1551_v19 }
 0x209   :  { %v942_v7 = vsel %vm927_vm2, %v930_v21, 0.0  ;;  %v943_v34 = vsel %vm2199_vm3, %v934_v45, 0.0  ;;  %v944_v35 = vsel %vm927_vm2, %v931_v22, 0.0  ;;  %v945_v36 = vsel %vm2199_vm3, %v935_v28, 0.0 }
 0x20a   :  { %v948_v39 = vpack.c.bf16 %v943_v34, %v942_v7  ;;  %v949_v40 = vpack.c.bf16 %v945_v36, %v944_v35  ;;  %v888_v4 = vsel %vm884_vm4, %v1571_v29, %v1561_v38  ;;  %v892_v5 = vsel %vm884_vm4, %v1561_v38, %v1571_v29 }
 0x20b   :  { %v887_v10 = vsel %vm884_vm4, %v1570_v56, %v1560_v51  ;;  %v891_v11 = vsel %vm884_vm4, %v1560_v51, %v1570_v56  ;;  %v901_v28 = vsel %vm893_vm5, %v892_v5, 0.0  ;;  %v902_v33 = vsel %vm2237_vm6, %v888_v4, 0.0 }
 0x20c   :  { %v998_v42 = vunpack.c.l.b16 %v948_v39  ;;  %v1000_v8 = vunpack.c.l.b16 %v949_v40  ;;  %v999_v44 = vunpack.c.h.b16 %v948_v39  ;;  %v1001_v47 = vunpack.c.h.b16 %v949_v40 }
 0x20d   :  { %v1554_v43 = vpop.permute.xlu0 %1553  ;;  %v899_v7 = vsel %vm893_vm5, %v891_v11, 0.0  ;;  %v900_v34 = vsel %vm2237_vm6, %v887_v10, 0.0 }
 0x20e   :  { %v1556_v52 = vunpack.i.h.bf16 %v1554_v43  ;;  %v1555_v53 = vunpack.i.l.bf16 %v1554_v43  ;;  %v1004_v55 = vpack.c.b16 %v1000_v8, %v998_v42  ;;  %v1005_v57 = vpack.c.b16 %v1001_v47, %v999_v44  ;;  %v1574_v13 = vpop.permute.xlu1 %1573 }
 0x20f   :  { %v1576_v17 = vunpack.i.h.bf16 %v1574_v13  ;;  %v1575_v18 = vunpack.i.l.bf16 %v1574_v13  ;;  %v905_v40 = vpack.c.bf16 %v900_v34, %v899_v7 }
 0x210   :  { %v929_v58 = vsel %vm927_vm2, %v1546_v41, %v1556_v52  ;;  %v933_v60 = vsel %vm927_vm2, %v1556_v52, %v1546_v41  ;;  %v928_v59 = vsel %vm927_vm2, %v1545_v27, %v1555_v53  ;;  %v932_v54 = vsel %vm927_vm2, %v1555_v53, %v1545_v27  ;;  %1033 = vmatpush.bf16.msra.mxu0 %v1004_v55 }
 0x211   :  { %v940_v61 = vsel %vm927_vm2, %v929_v58, 0.0  ;;  %v941_v31 = vsel %vm2199_vm3, %v933_v60, 0.0  ;;  %v938_v32 = vsel %vm927_vm2, %v928_v59, 0.0  ;;  %v939_v62 = vsel %vm2199_vm3, %v932_v54, 0.0  ;;  %1519 = vmatpush.bf16.msrb.mxu2 %v1004_v55  ;;  %1052 = vmatpush.bf16.msra.mxu1 %v1005_v57 }
 0x212   :  { %1525 = vmatpush.bf16.msrb.mxu3 %v1005_v57  ;;  %v946_v2 = vpack.c.bf16 %v939_v62, %v938_v32  ;;  %v947_v3 = vpack.c.bf16 %v941_v31, %v940_v61  ;;  %v906_v41 = vpack.c.bf16 %v902_v33, %v901_v28  ;;  %v958_v43 = vunpack.c.l.b16 %v905_v40  ;;  %v1076_v61 = vpop.permute.xlu2 %1075 }
 0x213   :  { %v959_v52 = vunpack.c.h.b16 %v905_v40 }
 0x214   :  { %v994_v12 = vunpack.c.l.b16 %v946_v2  ;;  %v996_v14 = vunpack.c.l.b16 %v947_v3  ;;  %v995_v15 = vunpack.c.h.b16 %v946_v2  ;;  %v997_v16 = vunpack.c.h.b16 %v947_v3 }
 0x215   :  { %v1564_v19 = vpop.permute.xlu0 %1563  ;;  %v960_v44 = vunpack.c.l.b16 %v906_v41  ;;  %v961_v53 = vunpack.c.h.b16 %v906_v41 }
 0x216   :  { %v1566_v20 = vunpack.i.h.bf16 %v1564_v19  ;;  %v1565_v21 = vunpack.i.l.bf16 %v1564_v19  ;;  %v1002_v22 = vpack.c.b16 %v996_v14, %v994_v12  ;;  %v1003_v45 = vpack.c.b16 %v997_v16, %v995_v15  ;;  %v1086_v5 = vpop.permute.xlu1 %1085 }
 0x217   :  { %v964_v6 = vpack.c.b16 %v960_v44, %v958_v43  ;;  %v965_v29 = vpack.c.b16 %v961_v53, %v959_v52 }
 0x218   :  { %v886_v35 = vsel %vm884_vm4, %v1566_v20, %v1576_v17  ;;  %v890_v36 = vsel %vm884_vm4, %v1576_v17, %v1566_v20  ;;  %v885_v37 = vsel %vm884_vm4, %v1565_v21, %v1575_v18  ;;  %v889_v39 = vsel %vm884_vm4, %v1575_v18, %v1565_v21  ;;  %1034 = vmatpush.bf16.msra.mxu0 %v1002_v22 }
 0x219   :  { %1520 = vmatpush.bf16.msrb.mxu2 %v1002_v22  ;;  %1053 = vmatpush.bf16.msra.mxu1 %v1003_v45  ;;  %v897_v42 = vsel %vm893_vm5, %v890_v36, 0.0  ;;  %v898_v8 = vsel %vm2237_vm6, %v886_v35, 0.0  ;;  %v895_v27 = vsel %vm893_vm5, %v889_v39, 0.0  ;;  %v896_v38 = vsel %vm2237_vm6, %v885_v37, 0.0 }
 0x21a   :  { %1526 = vmatpush.bf16.msrb.mxu3 %v1003_v45  ;;  %v903_v47 = vpack.c.bf16 %v896_v38, %v895_v27  ;;  %v904_v51 = vpack.c.bf16 %v898_v8, %v897_v42  ;;  %v1091_v22 = vpop.permute.xlu2 %1090 }
 0x21c   :  { %1035 = vmatpush.bf16.msra.mxu0 %v2181_v0  ;;  %v956_v55 = vunpack.c.l.b16 %v904_v51  ;;  %v955_v56 = vunpack.c.h.b16 %v903_v47 }
 0x21d   :  { %1521 = vmatpush.bf16.msrb.mxu2 %v2181_v0  ;;  %1054 = vmatpush.bf16.msra.mxu1 %v2183_v1  ;;  %v954_v0 = vunpack.c.l.b16 %v903_v47  ;;  %v1081_v12 = vpop.permute.xlu0 %1080 }
 0x21e   :  { %1527 = vmatpush.bf16.msrb.mxu3 %v2183_v1  ;;  %v957_v1 = vunpack.c.h.b16 %v904_v51 }
 0x21f   :  { %v962_v57 = vpack.c.b16 %v956_v55, %v954_v0 }
 0x220   :  { %1036 = vmatpush.bf16.msra.mxu0 %v2171_v48  ;;  %v963_v58 = vpack.c.b16 %v957_v1, %v955_v56 }
 0x221   :  { %1522 = vmatpush.bf16.msrb.mxu2 %v2171_v48  ;;  %1055 = vmatpush.bf16.msra.mxu1 %v2173_v50  ;;  %v1517_v48 = vld [vmem:[%s2325_s5] sm:$0xff] }
 0x222   :  { %1528 = vmatpush.bf16.msrb.mxu3 %v2173_v50  ;;  %v1518_v50 = vld [vmem:[%s2325_s5 + $0x8] sm:$0xff] }
 0x224   :  { %1037 = vmatpush.bf16.msra.mxu0 %v964_v6 }
 0x225   :  { %1523 = vmatpush.bf16.msrb.mxu2 %v964_v6  ;;  %1056 = vmatpush.bf16.msra.mxu1 %v965_v29 }
 0x226   :  { %1529 = vmatpush.bf16.msrb.mxu3 %v965_v29 }
 0x228   :  { %1038 = vmatpush.bf16.msra.mxu0 %v962_v57 }
 0x229   :  { %1524 = vmatpush.bf16.msrb.mxu2 %v962_v57  ;;  %1057 = vmatpush.bf16.msra.mxu1 %v963_v58 }
 0x22a   :  { %1530 = vmatpush.bf16.msrb.mxu3 %v963_v58 }
 0x22b   :  { %1445 = vmatmul.msk.bf16.vlgmr.msra.gmra.mxu0 %vm1024_vm7, %v1517_v48 }
 0x22c   :  { %1446 = vmatmul.msk.bf16.vlgmr.msrb.gmra.mxu2 %vm1024_vm7, %v1518_v50  ;;  %1447 = vmatmul.msk.bf16.vlgmr.msra.gmra.mxu1 %vm1024_vm7, %v1517_v48 }
 0x22d   :  { %1448 = vmatmul.msk.bf16.vlgmr.msrb.gmra.mxu3 %vm1024_vm7, %v1518_v50 }
 0x2a8   :  { %v1040_v60 = vpop.f32.mrf.mxu0 }
 0x2a9   :  { %v1041_v59 = vadd.f32 %v1040_v60, %v2146_v23  ;;  %v1059_v54 = vpop.f32.mrf.mxu1 }
 0x2aa   :  { %v1060_v31 = vadd.f32 %v1059_v54, %v2148_v24 }
 0x2ab   :  { %v1093_v32 = vadd.f32 %v1076_v61, %v1041_v59 }
 0x2ac   :  { %v1094_v62 = vadd.f32 %v1076_v61, %v1060_v31 }
 0x2ad   :  { %v1101_v63 = vmax.f32 %v1093_v32, 0.0 }
 0x2ae   :  { %v1102_v13 = vmax.f32 %v1094_v62, 0.0 }
 0x2af   :  { %1109 = vst [vmem:[%s2326_s7] sm:$0xff] %v1101_v63  ;;  %v1045_v2 = vpop.f32.mrf.mxu2 }
 0x2b0   :  { %1449 = vst [vmem:[%s2326_s7 + $0x20] sm:$0xff] %v1102_v13  ;;  %v1046_v3 = vadd.f32 %v1045_v2, %v2154_v26  ;;  %v1064_v23 = vpop.f32.mrf.mxu3  ;;  %v1042_v4 = vpop.f32.mrf.mxu0 }
 0x2b1   :  { %v1065_v24 = vadd.f32 %v1064_v23, %v2156_v9  ;;  %v1043_v10 = vadd.f32 %v1042_v4, %v2150_v49  ;;  %v1061_v11 = vpop.f32.mrf.mxu1 }
 0x2b2   :  { %v1097_v14 = vadd.f32 %v1086_v5, %v1046_v3  ;;  %v1062_v15 = vadd.f32 %v1061_v11, %v2152_v25 }
 0x2b3   :  { %v1098_v16 = vadd.f32 %v1086_v5, %v1065_v24  ;;  %v1095_v17 = vadd.f32 %v1081_v12, %v1043_v10 }
 0x2b4   :  { %v1105_v18 = vmax.f32 %v1097_v14, 0.0  ;;  %v1096_v19 = vadd.f32 %v1081_v12, %v1062_v15 }
 0x2b5   :  { %v1106_v20 = vmax.f32 %v1098_v16, 0.0  ;;  %v1103_v21 = vmax.f32 %v1095_v17, 0.0 }
 0x2b6   :  { %1111 = vst [vmem:[%s2326_s7 + $0x10] sm:$0xff] %v1105_v18  ;;  %v1104_v26 = vmax.f32 %v1096_v19, 0.0 }
 0x2b7   :  { %1451 = vst [vmem:[%s2326_s7 + $0x30] sm:$0xff] %v1106_v20  ;;  %v1047_v49 = vpop.f32.mrf.mxu2 }
 0x2b8   :  { %1110 = vst [vmem:[%s2326_s7 + $0x8] sm:$0xff] %v1103_v21  ;;  %v1048_v25 = vadd.f32 %v1047_v49, %v2158_v46  ;;  %v1066_v9 = vpop.f32.mrf.mxu3 }
 0x2b9   :  { %1450 = vst [vmem:[%s2326_s7 + $0x28] sm:$0xff] %v1104_v26  ;;  %v1067_v45 = vadd.f32 %v1066_v9, %v2162_v30 }
 0x2ba   :  { %v1099_v28 = vadd.f32 %v1091_v22, %v1048_v25 }
 0x2bb   :  { %v1100_v33 = vadd.f32 %v1091_v22, %v1067_v45 }
 0x2bc   :  { %v1107_v7 = vmax.f32 %v1099_v28, 0.0 }
 0x2bd   :  { %v1108_v34 = vmax.f32 %v1100_v33, 0.0 }
 0x2be   :  { %1112 = vst [vmem:[%s2326_s7 + $0x18] sm:$0xff] %v1107_v7 }
 0x2bf   :  { %1452 = vst [vmem:[%s2326_s7 + $0x38] sm:$0xff] %v1108_v34 }

</bundles_post_ra>
